<compile_context>
chip_gen: v7x
topology: tpu7x:2x2x1
jax: 0.10.0
libtpu: 0.0.40
codegen_flags: <defaults>
</compile_context>

<pallas_src>
import math
from functools import partial

import jax
import jax.numpy as jnp
from jax.experimental import pallas as pl
from jax.experimental.pallas import tpu as pltpu


# ----------------------------------------------------------------------------
# helpers
# ----------------------------------------------------------------------------
def _pick_tile(dim, target, align):
    """Tile size for `dim`.

    Returns the full dim when dim <= target (a full-extent block is always
    layout-legal), else the largest divisor of `dim` that is <= target and a
    multiple of `align`; falls back to the full dim if no such divisor exists.
    """
    if dim <= target:
        return dim
    t = (target // align) * align
    while t >= align:
        if dim % t == 0:
            return t
        t -= align
    return dim


_VMEM_LIMIT = 32 * 1024 * 1024  # explicit scoped-VMEM budget (v7x-safe)


# ----------------------------------------------------------------------------
# Tiled linear:  y = x @ w_t + b     (w_t pre-transposed to (D_in, D_out),
#                                     pre-cast to bf16 in param prep)
# ----------------------------------------------------------------------------
def _linear_kernel(x_ref, w_ref, b_ref, o_ref, acc_ref):
    @pl.when(pl.program_id(2) == 0)
    def _():
        acc_ref[...] = jnp.zeros_like(acc_ref)

    # bf16 MXU matmul with f32 accumulation.
    acc_ref[...] += jnp.dot(x_ref[...].astype(jnp.bfloat16), w_ref[...],
                            preferred_element_type=jnp.float32)

    @pl.when(pl.program_id(2) == pl.num_programs(2) - 1)
    def _():
        # Bias is added exactly once, on the final K step (in f32).
        o_ref[...] = (acc_ref[...] + b_ref[...].astype(jnp.float32)
                      ).astype(o_ref.dtype)


def linear(x2d, w_t, b, *, tm=512, tn=2048, tk=512):
    """x2d: (M, K) @ w_t: (K, N) bf16 + b: (N,) -> (M, N) in x2d.dtype."""
    M, K = x2d.shape
    K2, N = w_t.shape
    assert K == K2 and b.shape == (N,)

    tm = _pick_tile(M, tm, 8)     # sublane axis: multiple of 8 (or full dim)
    tn = _pick_tile(N, tn, 128)   # lane axis:    multiple of 128 (or full dim)
    tk = _pick_tile(K, tk, 128)
    grid = (M // tm, N // tn, K // tk)

    return pl.pallas_call(
        _linear_kernel,
        out_shape=jax.ShapeDtypeStruct((M, N), x2d.dtype),
        grid=grid,
        in_specs=[
            pl.BlockSpec((tm, tk), lambda i, j, k: (i, k)),
            pl.BlockSpec((tk, tn), lambda i, j, k: (k, j)),
            pl.BlockSpec((1, tn), lambda i, j, k: (0, j)),
        ],
        out_specs=pl.BlockSpec((tm, tn), lambda i, j, k: (i, j)),
        scratch_shapes=[pltpu.VMEM((tm, tn), jnp.float32)],
        compiler_params=pltpu.CompilerParams(
            dimension_semantics=("parallel", "parallel", "arbitrary"),
            vmem_limit_bytes=_VMEM_LIMIT),
        cost_estimate=pl.CostEstimate(
            flops=2 * M * N * K,
            transcendentals=0,
            bytes_accessed=(M * K * 4 * max(1, N // tn)
                            + K * N * 2 * max(1, M // tm)
                            + M * N * 4 + N * 4)),
    )(x2d, w_t, b.reshape(1, N))


# ----------------------------------------------------------------------------
# Flash-style scaled dot-product attention, heads folded into the block.
# Blocks: q (1, hb, tq, dk), k/v (1, hb, tk, dk); grid KV axis last.
# ----------------------------------------------------------------------------
def _flash_attn_kernel(q_ref, k_ref, v_ref, o_ref, m_sc, l_sc, acc_sc, *,
                       scale):
    kv = pl.program_id(3)

    @pl.when(kv == 0)
    def _():
        m_sc[...] = jnp.full_like(m_sc, -jnp.inf)
        l_sc[...] = jnp.zeros_like(l_sc)
        acc_sc[...] = jnp.zeros_like(acc_sc)

    # Fold softmax scale into q (tq*dk elements, not the (tq,tk) score tile),
    # then cast the MXU operands to bf16; accumulate in f32.
    q = (q_ref[0] * scale).astype(jnp.bfloat16)      # (hb, tq, dk)
    k = k_ref[0].astype(jnp.bfloat16)                # (hb, tk, dk)
    v = v_ref[0].astype(jnp.bfloat16)                # (hb, tk, dk)

    # scores = (q * scale) K^T   -> (hb, tq, tk), f32
    s = jnp.einsum("hqd,hkd->hqk", q, k, preferred_element_type=jnp.float32)

    m_prev = m_sc[...]
    m_new = jnp.maximum(m_prev, jnp.max(s, axis=-1, keepdims=True))
    alpha = jnp.exp(m_prev - m_new)
    p = jnp.exp(s - m_new)

    l_sc[...] = alpha * l_sc[...] + jnp.sum(p, axis=-1, keepdims=True)
    acc_sc[...] = alpha * acc_sc[...] + jnp.einsum(
        "hqk,hkd->hqd", p.astype(jnp.bfloat16), v,
        preferred_element_type=jnp.float32)
    m_sc[...] = m_new

    @pl.when(kv == pl.num_programs(3) - 1)
    def _():
        inv_l = pl.reciprocal(l_sc[...], approx=True)   # EUP slot, ~free
        o_ref[0] = (acc_sc[...] * inv_l).astype(o_ref.dtype)


def flash_attention(qh, kh, vh, d_k, *, tq=256, tk=512):
    """softmax(Q K^T / sqrt(d_k)) V for (B, H, S, d_k) tensors."""
    B, H, Sq, dk = qh.shape
    Bk, Hk, Skv, dkk = kh.shape
    assert (B, H, dk) == (Bk, Hk, dkk) and vh.shape == kh.shape

    tq = _pick_tile(Sq, tq, 8)
    tk = _pick_tile(Skv, tk, 128)

    # Fold heads into the block until hb*d_k ~ one MXU tile of lanes while
    # keeping the (hb, tq, tk) f32 score intermediate <= ~2 MiB.
    hb_cap = max(1, 512 // max(dk, 1))
    hb_cap = min(hb_cap, max(1, (2 * 1024 * 1024) // (4 * tq * tk)))
    hb = _pick_tile(H, hb_cap, 1)

    scale = 1.0 / math.sqrt(d_k)
    grid = (B, H // hb, Sq // tq, Skv // tk)

    q_spec = pl.BlockSpec((1, hb, tq, dk), lambda b, h, qi, ki: (b, h, qi, 0))
    kv_spec = pl.BlockSpec((1, hb, tk, dk), lambda b, h, qi, ki: (b, h, ki, 0))
    # NOTE: if a profile shows exposed K/V DMA after enlarging tk, deepen the
    # kv_spec pipeline with pipeline_mode=pl.Buffered(3).

    return pl.pallas_call(
        partial(_flash_attn_kernel, scale=scale),
        out_shape=jax.ShapeDtypeStruct((B, H, Sq, dk), qh.dtype),
        grid=grid,
        in_specs=[q_spec, kv_spec, kv_spec],
        out_specs=q_spec,
        scratch_shapes=[
            pltpu.VMEM((hb, tq, 1), jnp.float32),    # running max m
            pltpu.VMEM((hb, tq, 1), jnp.float32),    # running sum l
            pltpu.VMEM((hb, tq, dk), jnp.float32),   # output accumulator
        ],
        compiler_params=pltpu.CompilerParams(
            dimension_semantics=("parallel", "parallel", "parallel",
                                 "arbitrary"),
            vmem_limit_bytes=_VMEM_LIMIT),
        cost_estimate=pl.CostEstimate(
            flops=4 * B * H * Sq * Skv * dk,
            transcendentals=B * H * Sq * Skv,
            bytes_accessed=4 * B * H * dk * (2 * Sq + 2 * Skv)),
    )(qh, kh, vh)


# ----------------------------------------------------------------------------
# Parameters: PyTorch-style init + one-time prep (transpose / bf16 / QKV fuse)
# ----------------------------------------------------------------------------
def init_mha_params(key, d_model):
    """PyTorch nn.Linear-style uniform init; weights in (out, in) layout."""
    bound = 1.0 / math.sqrt(d_model)
    params = {}
    keys = jax.random.split(key, 8)
    for i, n in enumerate(["q", "k", "v", "o"]):
        params[f"W_{n}"] = jax.random.uniform(
            keys[2 * i], (d_model, d_model), jnp.float32, -bound, bound)
        params[f"b_{n}"] = jax.random.uniform(
            keys[2 * i + 1], (d_model,), jnp.float32, -bound, bound)
    return params


def prepare_mha_params(params):
    """One-time prep hoisted out of the forward pass: transpose weights to
    MXU-friendly (D_in, D_out), cast them to bf16, and build the fused
    (D, 3D) QKV weight / (3D,) bias for self-attention."""
    wq_t = params["W_q"].T
    wk_t = params["W_k"].T
    wv_t = params["W_v"].T
    wo_t = params["W_o"].T
    prep = {
        "wq_t": wq_t.astype(jnp.bfloat16),
        "wk_t": wk_t.astype(jnp.bfloat16),
        "wv_t": wv_t.astype(jnp.bfloat16),
        "wo_t": wo_t.astype(jnp.bfloat16),
        "w_qkv_t": jnp.concatenate([wq_t, wk_t, wv_t],
                                   axis=1).astype(jnp.bfloat16),
        "b_q": params["b_q"],
        "b_k": params["b_k"],
        "b_v": params["b_v"],
        "b_o": params["b_o"],
        "b_qkv": jnp.concatenate(
            [params["b_q"], params["b_k"], params["b_v"]]),
    }
    return prep


# ----------------------------------------------------------------------------
# Multi-head attention forward (wrapper)
# ----------------------------------------------------------------------------
def mha_forward(prep, Q, K, V, num_heads):
    B, Sq, D = Q.shape
    Bk, Skv, Dk = K.shape
    assert D % num_heads == 0 and Dk == D and Bk == B and V.shape == K.shape
    d_k = D // num_heads

    if (Q is K) and (K is V):
        # Self-attention: fused QKV projection -> the activation is read from
        # HBM once and a single matmul kernel is launched.
        qkv = linear(Q.reshape(B * Sq, D), prep["w_qkv_t"], prep["b_qkv"])
        # One reshape+transpose splits Q/K/V and heads simultaneously.
        qkvh = qkv.reshape(B, Sq, 3, num_heads, d_k).transpose(2, 0, 3, 1, 4)
        Qh, Kh, Vh = qkvh[0], qkvh[1], qkvh[2]              # (B, H, S, d_k)
    else:
        def split_heads(x2d, s):
            return x2d.reshape(B, s, num_heads, d_k).transpose(0, 2, 1, 3)
        Qh = split_heads(linear(Q.reshape(B * Sq, D), prep["wq_t"],
                                prep["b_q"]), Sq)
        Kh = split_heads(linear(K.reshape(B * Skv, D), prep["wk_t"],
                                prep["b_k"]), Skv)
        Vh = split_heads(linear(V.reshape(B * Skv, D), prep["wv_t"],
                                prep["b_v"]), Skv)

    attn = flash_attention(Qh, Kh, Vh, d_k)                 # (B, H, Sq, d_k)

    combined = attn.transpose(0, 2, 1, 3).reshape(B * Sq, D)
    out = linear(combined, prep["wo_t"], prep["b_o"])
    return out.reshape(B, Sq, D)


# ----------------------------------------------------------------------------
# Pure-JAX f32 reference for validation
# ----------------------------------------------------------------------------
def mha_reference(params, Q, K, V, num_heads):
    B, Sq, D = Q.shape
    _, Skv, _ = K.shape
    d_k = D // num_heads

    def lin(x, w, b):
        return x @ w.T + b

    def split(x, s):
        return x.reshape(B, s, num_heads, d_k).transpose(0, 2, 1, 3)

    Qh = split(lin(Q, params["W_q"], params["b_q"]), Sq)
    Kh = split(lin(K, params["W_k"], params["b_k"]), Skv)
    Vh = split(lin(V, params["W_v"], params["b_v"]), Skv)
    scores = jnp.einsum("bhqd,bhkd->bhqk", Qh, Kh) / math.sqrt(d_k)
    probs = jax.nn.softmax(scores, axis=-1)
    attn = jnp.einsum("bhqk,bhkd->bhqd", probs, Vh)
    comb = attn.transpose(0, 2, 1, 3).reshape(B, Sq, D)
    return lin(comb, params["W_o"], params["b_o"])


if __name__ == "__main__":
    # Small shapes consistent with the module: batch=2, seq=8, d_model=32, heads=4
    B, S, D, H = 2, 8, 32, 4
    key = jax.random.PRNGKey(0)
    kp, kx, kq, kk, kv = jax.random.split(key, 5)

    params = init_mha_params(kp, D)
    prep = jax.block_until_ready(prepare_mha_params(params))   # one-time prep

    # Tolerance accommodates bf16 MXU inputs (f32 accumulation).
    ATOL = RTOL = 1e-2

    # 1) Self-attention path (exercises the fused-QKV projection).
    x = jax.random.normal(kx, (B, S, D), jnp.float32)
    out_self = jax.block_until_ready(mha_forward(prep, x, x, x, H))
    ref_self = mha_reference(params, x, x, x, H)
    assert out_self.shape == (B, S, D)
    assert jnp.allclose(out_self, ref_self, atol=ATOL, rtol=RTOL), \
        "self-attention mismatch vs reference"

    # 2) Cross-attention path (separate Q/K/V projections).
    Q = jax.random.normal(kq, (B, S, D), jnp.float32)
    K = jax.random.normal(kk, (B, S, D), jnp.float32)
    V = jax.random.normal(kv, (B, S, D), jnp.float32)
    out_cross = jax.block_until_ready(mha_forward(prep, Q, K, V, H))
    ref_cross = mha_reference(params, Q, K, V, H)
    assert jnp.allclose(out_cross, ref_cross, atol=ATOL, rtol=RTOL), \
        "cross-attention mismatch vs reference"

    print("KERNEL_OK")
</pallas_src>

<mosaic_0001>
module attributes {stable_mosaic.version = 11 : i64} {
  func.func @_linear_kernel(%arg0: i32, %arg1: i32, %arg2: i32, %arg3: memref<16x32xf32, #tpu.memory_space<vmem>>, %arg4: memref<32x96xbf16, #tpu.memory_space<vmem>>, %arg5: memref<1x96xf32, #tpu.memory_space<vmem>>, %arg6: memref<16x96xf32, #tpu.memory_space<vmem>>, %arg7: memref<16x96xf32, #tpu.memory_space<vmem>>) attributes {dimension_semantics = [#tpu.dimension_semantics<parallel>, #tpu.dimension_semantics<parallel>, #tpu.dimension_semantics<arbitrary>], iteration_bounds = array<i64: 1, 1, 1>, scalar_prefetch = 0 : i64, scratch_operands = 1 : i64, tpu.core_type = #tpu.core_type<tc>, window_params = [{transform_indices = @transform_0, window_bounds = array<i64: 16, 32>}, {transform_indices = @transform_1, window_bounds = array<i64: 32, 96>}, {transform_indices = @transform_2, window_bounds = array<i64: 1, 96>}, {transform_indices = @transform_3, window_bounds = array<i64: 16, 96>}]} {
    %c0_i32 = arith.constant 0 : i32
    %0 = arith.cmpi eq, %arg2, %c0_i32 : i32
    %1 = arith.extui %0 : i1 to i32
    %c0_i32_0 = arith.constant 0 : i32
    %2 = arith.cmpi ne, %1, %c0_i32_0 : i32
    scf.if %2 {
      %cst_10 = arith.constant 0.000000e+00 : f32
      %13 = vector.broadcast %cst_10 : f32 to vector<16x96xf32>
      %c0_11 = arith.constant 0 : index
      %c0_12 = arith.constant 0 : index
      %14 = vector.load %arg7[%c0_11, %c0_12] : memref<16x96xf32, #tpu.memory_space<vmem>>, vector<16x96xf32>
      tpu.vector_store %arg7[%c0_11, %c0_12], %13 {strides = array<i32>} : memref<16x96xf32, #tpu.memory_space<vmem>>, vector<16x96xf32>,
    } else {
    }
    %c0 = arith.constant 0 : index
    %c0_1 = arith.constant 0 : index
    %3 = vector.load %arg7[%c0, %c0_1] : memref<16x96xf32, #tpu.memory_space<vmem>>, vector<16x96xf32>
    %c0_2 = arith.constant 0 : index
    %c0_3 = arith.constant 0 : index
    %4 = vector.load %arg3[%c0_2, %c0_3] : memref<16x32xf32, #tpu.memory_space<vmem>>, vector<16x32xf32>
    %5 = arith.truncf %4 : vector<16x32xf32> to vector<16x32xbf16>
    %c0_4 = arith.constant 0 : index
    %c0_5 = arith.constant 0 : index
    %6 = vector.load %arg4[%c0_4, %c0_5] : memref<32x96xbf16, #tpu.memory_space<vmem>>, vector<32x96xbf16>
    %cst = arith.constant dense<0.000000e+00> : vector<16x96xf32>
    %7 = tpu.matmul %5, %6, %cst {dimension_numbers = #tpu.dot_dimension_numbers<[1], [0], [0], [1], [0, 0, 1, 1], [], []>} : vector<16x32xbf16>, vector<32x96xbf16>, vector<16x96xf32> -> vector<16x96xf32>
    %8 = arith.addf %3, %7 : vector<16x96xf32>
    %c0_6 = arith.constant 0 : index
    %c0_7 = arith.constant 0 : index
    %9 = vector.load %arg7[%c0_6, %c0_7] : memref<16x96xf32, #tpu.memory_space<vmem>>, vector<16x96xf32>
    tpu.vector_store %arg7[%c0_6, %c0_7], %8 {strides = array<i32>} : memref<16x96xf32, #tpu.memory_space<vmem>>, vector<16x96xf32>,
    %c0_i32_8 = arith.constant 0 : i32
    %10 = arith.cmpi eq, %arg2, %c0_i32_8 : i32
    %11 = arith.extui %10 : i1 to i32
    %c0_i32_9 = arith.constant 0 : i32
    %12 = arith.cmpi ne, %11, %c0_i32_9 : i32
    scf.if %12 {
      %c0_10 = arith.constant 0 : index
      %c0_11 = arith.constant 0 : index
      %13 = vector.load %arg7[%c0_10, %c0_11] : memref<16x96xf32, #tpu.memory_space<vmem>>, vector<16x96xf32>
      %c0_12 = arith.constant 0 : index
      %c0_13 = arith.constant 0 : index
      %14 = vector.load %arg5[%c0_12, %c0_13] : memref<1x96xf32, #tpu.memory_space<vmem>>, vector<1x96xf32>
      %15 = vector.broadcast %14 : vector<1x96xf32> to vector<16x96xf32>
      %16 = arith.addf %13, %15 : vector<16x96xf32>
      %c0_14 = arith.constant 0 : index
      %c0_15 = arith.constant 0 : index
      %17 = vector.load %arg6[%c0_14, %c0_15] : memref<16x96xf32, #tpu.memory_space<vmem>>, vector<16x96xf32>
      tpu.vector_store %arg6[%c0_14, %c0_15], %16 {strides = array<i32>} : memref<16x96xf32, #tpu.memory_space<vmem>>, vector<16x96xf32>,
    } else {
    }
    return
  }
  func.func @transform_0(%arg0: i32, %arg1: i32, %arg2: i32) -> (i32, i32) {
    %c0_i32 = arith.constant 0 : i32
    return %arg0, %arg2 : i32, i32
  }
  func.func @transform_1(%arg0: i32, %arg1: i32, %arg2: i32) -> (i32, i32) {
    %c0_i32 = arith.constant 0 : i32
    return %arg2, %arg1 : i32, i32
  }
  func.func @transform_2(%arg0: i32, %arg1: i32, %arg2: i32) -> (i32, i32) {
    %c0_i32 = arith.constant 0 : i32
    %c0_i32_0 = arith.constant 0 : i32
    return %c0_i32, %arg1 : i32, i32
  }
  func.func @transform_3(%arg0: i32, %arg1: i32, %arg2: i32) -> (i32, i32) {
    %c0_i32 = arith.constant 0 : i32
    return %arg0, %arg1 : i32, i32
  }
}

</mosaic_0001>

<bundles_post_ra>
// kernel: tpu_custom_call.1
= control target key start
LH: loop header
LB: loop body
LE: loop exit
PB: predicated region body
PF: predicated region fallthrough
CT: control target
= control target key end

     0   :  { %8 = vsyncpa [#allocation4], 0  ;;  %s334_s0 = inlined_call_operand.hbm [shape: f32[16,32], index: 0, kind: input, shape index: {}]   ;;  %s335_s1 = inlined_call_operand.hbm [shape: bf16[32,96], index: 1, kind: input, shape index: {}]   ;;  %s336_s2 = inlined_call_operand.vmem [shape: f32[1,96], index: 2, kind: input, shape index: {}]   ;;  %s337_s3 = inlined_call_operand.hbm [shape: f32[16,96], index: 3, kind: output, shape index: {}]  }
   0x1   :  { %9 = vsyncpa [#allocation7], 0 }
   0x2   :  { %10 = vsyncpa [#allocation5], 0  ;;  %s254_s12 = smov [#allocation3]   ;;  %s182_s16 = scalar_lea.hbm %s334_s0, 256 }
   0x3   :  { %s16_s13 = sshll.u32 %s254_s12, 4  ;;  %p183_p0 = scmp.ne.s32.totalorder %s334_s0, %s182_s16  ;;  %s17_s13 = int_to_ptr.vmem [resolvable:$true] %s16_s13 }
   0x4   :  { %p186_p1 = scmp.lt.u32.totalorder %s182_s16, %s334_s0 }
   0x6   :  { %p188_p2 = pnand %p186_p1, %p183_p0 }
   0x8   :  { %191 = shalt.err (!%p188_p2)
}
   0x9   :  { %s192_s21 = scalar_lea.vmem %s17_s13, 256  ;;  %p197_p4 = scmp.lt.s32.totalorder %s17_s13, %s17_s13 }
   0xa   :  { %p193_p3 = scmp.ne.s32.totalorder %s17_s13, %s192_s21  ;;  %p198_p5 = scmp.lt.s32.totalorder %s192_s21, %s192_s21 }
   0xc   :  { %p199_p6 = por %p198_p5, %p197_p4 }
   0xe   :  { %p200_p7 = pnand %p199_p6, %p193_p3 }
  0x10   :  { %203 = shalt.err (!%p200_p7)
}
  0x11   :  { %s255_s22 = smov 128   ;;  %s256_s23 = smov 8  }
  0x12   :  { %22 = dma.hbm_to_vmem [thread:$0]  %s334_s0, 256, %s17_s13, [#allocation4], %s255_s22, %s255_s22, %s256_s23  }
  0x13   :  { %s257_s26 = smov [#allocation6]   ;;  %s204_s30 = scalar_lea.hbm %s335_s1, 256 }
  0x14   :  { %s28_s27 = sshll.u32 %s257_s26, 4  ;;  %p205_p8 = scmp.ne.s32.totalorder %s335_s1, %s204_s30  ;;  %s29_s27 = int_to_ptr.vmem [resolvable:$true] %s28_s27 }
  0x15   :  { %p208_p9 = scmp.lt.u32.totalorder %s204_s30, %s335_s1 }
  0x17   :  { %p210_p10 = pnand %p208_p9, %p205_p8 }
  0x19   :  { %213 = shalt.err (!%p210_p10)
}
  0x1a   :  { %s214_s8 = scalar_lea.vmem %s29_s27, 256  ;;  %p219_p12 = scmp.lt.s32.totalorder %s29_s27, %s29_s27 }
  0x1b   :  { %p215_p11 = scmp.ne.s32.totalorder %s29_s27, %s214_s8  ;;  %p220_p13 = scmp.lt.s32.totalorder %s214_s8, %s214_s8 }
  0x1d   :  { %p221_p0 = por %p220_p13, %p219_p12 }
  0x1f   :  { %p222_p1 = pnand %p221_p0, %p215_p11 }
  0x21   :  { %225 = shalt.err (!%p222_p1)
}
  0x22   :  { %s258_s0 = smov 64   ;;  %s259_s9 = smov 4  }
  0x23   :  { %34 = dma.hbm_to_vmem [thread:$0]  %s335_s1, 256, %s29_s27, [#allocation7], %s258_s0, %s258_s0, %s259_s9  }
  0x24   :  { %248 = dma.done.wait [#allocation4], 256  }
  0x25   :  { %249 = vsyncadd [#allocation4], 4294967040 }
  0x26   :  { %250 = dma.done.wait [#allocation7], 256  }
  0x27   :  { %251 = vsyncadd [#allocation7], 4294967040  ;;  %vm48_vm0 = vcmask 785408   ;;  %v260_v0 = vmov 0.0   ;;  %vm261_vm1 = vmmov 0   ;;  %v180_v1 = vld [vmem:[#allocation6] sm:$0xff]  }
  0x28   :  { %49 = vst.msk [vmem:[#allocation2] sm:$0xff] %vm48_vm0, %v260_v0  ;;  %50 = vst.msk [vmem:[#allocation2 + $0x8] sm:$0xff] %vm48_vm0, %v260_v0  ;;  %163 = vmatprep.subr.bf16.mxu0 %v260_v0  ;;  %167 = vmatprep.mubr.msk.bf16.mxu0 %vm261_vm1, %v260_v0  ;;  %v181_v2 = vld [vmem:[#allocation6 + $0x8] sm:$0xff]   ;;  %v53_v3 = vld [vmem:[#allocation3] sm:$0xff]  ;;  %vm72_vm2 = vcmask 261120   ;;  %s262_s13 = smov [#allocation8]  }
  0x29   :  { %164 = vmatpush3.bf16.msra.mxu0 %v180_v1  ;;  %v54_v4 = vld [vmem:[#allocation3 + $0x8] sm:$0xff]  ;;  %v159_v14 = vld [vmem:[%s336_s2] ss:$0 sm:$0xff]  ;;  %s143_s14 = sshll.u32 %s262_s13, 4  ;;  %s144_s14 = int_to_ptr.vmem [resolvable:$true] %s143_s14 }
  0x2a   :  { %165 = vmatprep.subr.bf16.mxu0 %v260_v0  ;;  %v55_v5 = vpack.c.bf16 %v54_v4, %v53_v3  ;;  %s226_s15 = scalar_lea.vmem %s144_s14, 256  ;;  %p231_p3 = scmp.lt.s32.totalorder %s144_s14, %s144_s14 }
  0x2b   :  { %p227_p2 = scmp.ne.s32.totalorder %s144_s14, %s226_s15  ;;  %p232_p4 = scmp.lt.s32.totalorder %s226_s15, %s226_s15 }
  0x2d   :  { %166 = vmatpush3.bf16.msra.mxu0 %v181_v2  ;;  %p233_p5 = por %p232_p4, %p231_p3 }
  0x2f   :  { %v51_v6 = vld [vmem:[#allocation2] sm:$0xff]  ;;  %v52_v8 = vld [vmem:[#allocation2 + $0x8] sm:$0xff]  ;;  %p234_p6 = pnand %p233_p5, %p227_p2 }
  0x30   :  { %168 = vmatmul.mubr.msk.bf16.vlgmr.msra.gmra.mrb[0].mxu0 %vm72_vm2, %v55_v5 }
 0x103   :  { %v110_v7 = vpop.f32.mrb[0].mxu0 }
 0x104   :  { %v117_v9 = vadd.f32 %v110_v7, %v51_v6  ;;  %v169_v10 = vpop.f32.mrb[1].mxu0 }
 0x105   :  { %v113_v11 = vpop.f32.mrb[2].mxu0 }
 0x106   :  { %120 = vst.msk [vmem:[#allocation2] sm:$0xff] %vm48_vm0, %v117_v9  ;;  %v118_v12 = vadd.f32 %v113_v11, %v52_v8  ;;  %v170_v13 = vpop.f32.mrb[3].mxu0 }
 0x108   :  { %121 = vst.msk [vmem:[#allocation2 + $0x8] sm:$0xff] %vm48_vm0, %v118_v12 }
 0x10d   :  { %v125_v15 = vld [vmem:[#allocation2] sm:$0xff] }
 0x10e   :  { %v134_v16 = vadd.f32 %v159_v14, %v125_v15 }
 0x10f   :  { %v126_v17 = vld [vmem:[#allocation2 + $0x8] sm:$0xff] }
 0x110   :  { %v135_v18 = vadd.f32 %v159_v14, %v126_v17  ;;  %136 = vst.msk [vmem:[#allocation8] sm:$0xff] %vm48_vm0, %v134_v16 }
 0x112   :  { %137 = vst.msk [vmem:[#allocation8 + $0x8] sm:$0xff] %vm48_vm0, %v135_v18 }
 0x113   :  { %237 = shalt.err (!%p234_p6)
}
 0x114   :  { %s238_s17 = scalar_lea.hbm %s337_s3, 256 }
 0x115   :  { %p239_p7 = scmp.ne.s32.totalorder %s337_s3, %s238_s17  ;;  %p242_p8 = scmp.lt.u32.totalorder %s238_s17, %s337_s3 }
 0x117   :  { %p244_p9 = pnand %p242_p8, %p239_p7 }
 0x119   :  { %247 = shalt.err (!%p244_p9)
}
 0x11a   :  { %149 = dma.vmem_to_hbm [thread:$0]  %s144_s14, 256, %s337_s3, [#allocation5], %s255_s22, %s255_s22, %s256_s23  }
 0x11b   :  { %252 = dma.done.wait [#allocation5], 256  }
 0x11c   :  { %253 = vsyncadd [#allocation5], 4294967040 }
 0x11d   :  { %153 = vsyncpa [#allocation4], 1 }
 0x11e   :  { %154 = vsyncpa [#allocation7], 1 }
 0x11f   :  { %155 = vsyncpa [#allocation5], 1 }

</bundles_post_ra>
